<compile_context>
chip_gen: v5e
topology: v5e:2x2
jax: 0.10.0
libtpu: 0.0.40
codegen_flags: <defaults>
</compile_context>

<pallas_src>
import functools

import numpy as np

import jax
import jax.numpy as jnp
from jax import lax
from jax.experimental import pallas as pl
from jax.experimental.pallas import tpu as pltpu


# ----------------------------------------------------------------------------
# Weight pre-packing (runs once, on host, outside jit)
# ----------------------------------------------------------------------------
def _pack_toeplitz(w_hwio, w_sp):
    """Pack HWIO conv weights for 'same' padding into per-kh matmul matrices.

    Returns M of shape (KH, (w_sp+KW-1)*Cin, w_sp*Cout) with
      M[kh, wp*Cin + ci, w*Cout + co] = W[kh, wp-w, ci, co]  if 0 <= wp-w < KW
    so a row-band (H, Wp*Cin) of the padded input times M[kh], summed over kh,
    is exactly the convolution output in (h, w*Cout + co) layout.
    """
    w = np.asarray(w_hwio, np.float32)
    kh_n, kw_n, cin, cout = w.shape
    wp_n = w_sp + kw_n - 1
    m = np.zeros((kh_n, wp_n * cin, w_sp * cout), np.float32)
    for kh in range(kh_n):
        for wo in range(w_sp):
            for kw in range(kw_n):
                wp = wo + kw
                m[kh, wp * cin:(wp + 1) * cin, wo * cout:(wo + 1) * cout] = w[kh, kw]
    return m


def pack_inception_params(params, w_sp):
    """Fuse the 1x1 branches, Toeplitz-pack the 3x3/5x5 convs, cast to bf16."""
    w11, b11 = params["p1_1"]
    w21, b21 = params["p2_1"]
    w22, b22 = params["p2_2"]
    w31, b31 = params["p3_1"]
    w32, b32 = params["p3_2"]
    w42, b42 = params["p4_2"]

    def pack_1x1(ws, bs):
        mats = [_pack_toeplitz(w, w_sp)[0] for w in ws]        # (W*Cin, W*Cb)
        bias = [np.tile(np.asarray(b, np.float32), w_sp) for b in bs]
        return np.concatenate(mats, axis=1), np.concatenate(bias)[None, :]

    m1, b1 = pack_1x1([w11, w21, w31], [b11, b21, b31])        # fused p1_1|p2_1|p3_1
    m4, b4 = pack_1x1([w42], [b42])                            # p4_2 after the pool

    m2 = _pack_toeplitz(w22, w_sp)
    b2 = np.tile(np.asarray(b22, np.float32), w_sp)[None, :]
    m3 = _pack_toeplitz(w32, w_sp)
    b3 = np.tile(np.asarray(b32, np.float32), w_sp)[None, :]

    return {
        "m1": jnp.asarray(m1, jnp.bfloat16), "b1": jnp.asarray(b1, jnp.float32),
        "m2": jnp.asarray(m2, jnp.bfloat16), "b2": jnp.asarray(b2, jnp.float32),
        "m3": jnp.asarray(m3, jnp.bfloat16), "b3": jnp.asarray(b3, jnp.float32),
        "m4": jnp.asarray(m4, jnp.bfloat16), "b4": jnp.asarray(b4, jnp.float32),
    }


# ----------------------------------------------------------------------------
# Fused Inception kernel (one grid step = one batch element)
# ----------------------------------------------------------------------------
def _inception_kernel(x_ref, m1_ref, b1_ref, m2_ref, b2_ref, m3_ref, b3_ref,
                      m4_ref, b4_ref, o_ref, pad2_ref, pad3_ref, pad4_ref,
                      *, W, Cin, C1, C2a, C2b, C3a, C3b, C4, K2, K3):
    H = x_ref.shape[1]

    x2d = x_ref[0]                                  # (H, W*Cin) f32
    x_bf = x2d.astype(jnp.bfloat16)

    # ---- fused 1x1 convs on x (p1_1 | p2_1 | p3_1): one MXU matmul ---------
    y = jnp.dot(x_bf, m1_ref[...], preferred_element_type=jnp.float32)
    y = jnp.maximum(y + b1_ref[...], 0.0)           # (H, W*(C1+C2a+C3a)) f32
    p1 = y[:, :W * C1]                              # branch-1 output
    mid2 = y[:, W * C1:W * (C1 + C2a)]              # relu(p2_1(x))
    mid3 = y[:, W * (C1 + C2a):]                    # relu(p3_1(x))

    # ---- branch 2: 3x3 conv (pad 1); padding built in VMEM scratch ---------
    P2 = (K2 - 1) // 2
    pad2_ref[...] = jnp.zeros(pad2_ref.shape, pad2_ref.dtype)
    pad2_ref[pl.ds(P2, H), pl.ds(P2 * C2a, W * C2a)] = mid2.astype(jnp.bfloat16)
    acc2 = jnp.zeros((H, W * C2b), jnp.float32)
    for kh in range(K2):                            # K2 matmuls, no per-tap copies
        acc2 += jnp.dot(pad2_ref[pl.ds(kh, H), :], m2_ref[kh],
                        preferred_element_type=jnp.float32)
    p2 = jnp.maximum(acc2 + b2_ref[...], 0.0)       # (H, W*C2b)

    # ---- branch 3: 5x5 conv (pad 2) ----------------------------------------
    P3 = (K3 - 1) // 2
    pad3_ref[...] = jnp.zeros(pad3_ref.shape, pad3_ref.dtype)
    pad3_ref[pl.ds(P3, H), pl.ds(P3 * C3a, W * C3a)] = mid3.astype(jnp.bfloat16)
    acc3 = jnp.zeros((H, W * C3b), jnp.float32)
    for kh in range(K3):
        acc3 += jnp.dot(pad3_ref[pl.ds(kh, H), :], m3_ref[kh],
                        preferred_element_type=jnp.float32)
    p3 = jnp.maximum(acc3 + b3_ref[...], 0.0)       # (H, W*C3b)

    # ---- branch 4: 3x3 max pool (stride 1, pad 1) then 1x1 conv + ReLU -----
    neg = jnp.finfo(jnp.float32).min
    pad4_ref[...] = jnp.full(pad4_ref.shape, neg, pad4_ref.dtype)
    pad4_ref[pl.ds(1, H), pl.ds(Cin, W * Cin)] = x2d
    pooled = pad4_ref[pl.ds(1, H), pl.ds(Cin, W * Cin)]     # centre tap = init
    for kh in range(3):
        for kw in range(3):
            if kh == 1 and kw == 1:
                continue                                    # 8 maxima, not 9
            pooled = jnp.maximum(
                pooled, pad4_ref[pl.ds(kh, H), pl.ds(kw * Cin, W * Cin)])
    p4 = jnp.dot(pooled.astype(jnp.bfloat16), m4_ref[...],
                 preferred_element_type=jnp.float32)
    p4 = jnp.maximum(p4 + b4_ref[...], 0.0)         # (H, W*C4)

    # ---- channel concat == one lane-dense store (W*C_total lanes) ----------
    o_ref[0] = jnp.concatenate([p1, p2, p3, p4], axis=-1)


# ----------------------------------------------------------------------------
# Wrapper
# ----------------------------------------------------------------------------
@jax.jit
def inception_forward(packed, x_nchw):
    N, Cin, H, W = x_nchw.shape
    m1, b1 = packed["m1"], packed["b1"]
    m2, b2 = packed["m2"], packed["b2"]
    m3, b3 = packed["m3"], packed["b3"]
    m4, b4 = packed["m4"], packed["b4"]

    # static channel config derived from packed shapes
    K2, K3 = m2.shape[0], m3.shape[0]
    C2a = m2.shape[1] // (W + K2 - 1)
    C2b = m2.shape[2] // W
    C3a = m3.shape[1] // (W + K3 - 1)
    C3b = m3.shape[2] // W
    C1 = m1.shape[1] // W - C2a - C3a
    C4 = m4.shape[1] // W
    C_total = C1 + C2b + C3b + C4

    # NCHW -> (N, H, W*Cin) channels-last row layout expected by the kernel
    x_p = jnp.transpose(x_nchw, (0, 2, 3, 1)).reshape(N, H, W * Cin)
    x_p = x_p.astype(jnp.float32)

    kernel = functools.partial(
        _inception_kernel, W=W, Cin=Cin, C1=C1, C2a=C2a, C2b=C2b,
        C3a=C3a, C3b=C3b, C4=C4, K2=K2, K3=K3)

    flops = int(2 * N * H * (
        (W * Cin) * (W * (C1 + C2a + C3a))
        + K2 * ((W + K2 - 1) * C2a) * (W * C2b)
        + K3 * ((W + K3 - 1) * C3a) * (W * C3b)
        + (W * Cin) * (W * C4)))
    bytes_accessed = int(
        x_p.size * 4
        + sum(v.size * v.dtype.itemsize for v in (m1, b1, m2, b2, m3, b3, m4, b4))
        + N * H * W * C_total * 4)

    out = pl.pallas_call(
        kernel,
        out_shape=jax.ShapeDtypeStruct((N, H, W * C_total), jnp.float32),
        grid_spec=pltpu.PrefetchScalarGridSpec(
            num_scalar_prefetch=0,
            grid=(N,),
            in_specs=[
                pl.BlockSpec((1, H, W * Cin), lambda n: (n, 0, 0)),
                pl.BlockSpec(m1.shape, lambda n: (0, 0)),
                pl.BlockSpec(b1.shape, lambda n: (0, 0)),
                pl.BlockSpec(m2.shape, lambda n: (0, 0, 0)),
                pl.BlockSpec(b2.shape, lambda n: (0, 0)),
                pl.BlockSpec(m3.shape, lambda n: (0, 0, 0)),
                pl.BlockSpec(b3.shape, lambda n: (0, 0)),
                pl.BlockSpec(m4.shape, lambda n: (0, 0)),
                pl.BlockSpec(b4.shape, lambda n: (0, 0)),
            ],
            out_specs=pl.BlockSpec((1, H, W * C_total), lambda n: (n, 0, 0)),
            scratch_shapes=[
                pltpu.VMEM((H + K2 - 1, (W + K2 - 1) * C2a), jnp.bfloat16),
                pltpu.VMEM((H + K3 - 1, (W + K3 - 1) * C3a), jnp.bfloat16),
                pltpu.VMEM((H + 2, (W + 2) * Cin), jnp.float32),
            ],
        ),
        compiler_params=pltpu.CompilerParams(
            dimension_semantics=("parallel",),          # batch across TCs (v7x)
            vmem_limit_bytes=32 * 1024 * 1024,          # safe on v5e/v6e/v7x
        ),
        cost_estimate=pl.CostEstimate(
            flops=flops, transcendentals=0, bytes_accessed=bytes_accessed),
    )(x_p, m1, b1, m2, b2, m3, b3, m4, b4)

    # decode (N, H, [branch-blocks of w*Cb]) back to NCHW, concat order p1..p4
    pieces, col = [], 0
    for cb in (C1, C2b, C3b, C4):
        blk = out[:, :, col:col + W * cb].reshape(N, H, W, cb)
        pieces.append(jnp.transpose(blk, (0, 3, 1, 2)))
        col += W * cb
    return jnp.concatenate(pieces, axis=1)


# ----------------------------------------------------------------------------
# Synthetic parameters + pure-JAX reference (for a correctness check)
# ----------------------------------------------------------------------------
def init_conv_params(key, cin, cout, k):
    kw_key, kb_key = jax.random.split(key)
    fan_in = cin * k * k
    bound = 1.0 / np.sqrt(fan_in)
    w = jax.random.uniform(kw_key, (k, k, cin, cout), jnp.float32, -bound, bound)
    b = jax.random.uniform(kb_key, (cout,), jnp.float32, -bound, bound)
    return w, b


def make_inception_params(key, in_channel, L1, L2, L3, L4):
    keys = jax.random.split(key, 6)
    return {
        "p1_1": init_conv_params(keys[0], in_channel, L1, 1),
        "p2_1": init_conv_params(keys[1], in_channel, L2[0], 1),
        "p2_2": init_conv_params(keys[2], L2[0], L2[1], 3),
        "p3_1": init_conv_params(keys[3], in_channel, L3[0], 1),
        "p3_2": init_conv_params(keys[4], L3[0], L3[1], 5),
        "p4_2": init_conv_params(keys[5], in_channel, L4, 1),
    }


def _reference_forward(params, x_nchw):
    """Plain-JAX f32 reference matching the PyTorch module semantics."""
    x = jnp.transpose(x_nchw, (0, 2, 3, 1))
    dn = ("NHWC", "HWIO", "NHWC")

    def conv(v, wb, pad):
        w, b = wb
        out = lax.conv_general_dilated(v, w, (1, 1), [(pad, pad), (pad, pad)],
                                       dimension_numbers=dn)
        return out + b

    p1 = jax.nn.relu(conv(x, params["p1_1"], 0))
    p2 = jax.nn.relu(conv(jax.nn.relu(conv(x, params["p2_1"], 0)), params["p2_2"], 1))
    p3 = jax.nn.relu(conv(jax.nn.relu(conv(x, params["p3_1"], 0)), params["p3_2"], 2))
    pool = lax.reduce_window(x, -jnp.inf, lax.max, (1, 3, 3, 1), (1, 1, 1, 1), "SAME")
    p4 = jax.nn.relu(conv(pool, params["p4_2"], 0))
    out = jnp.concatenate([p1, p2, p3, p4], axis=-1)
    return jnp.transpose(out, (0, 3, 1, 2))


if __name__ == "__main__":
    key = jax.random.PRNGKey(0)
    k_x, k_p = jax.random.split(key)

    # Small shapes: batch=2, in_channel=4, spatial=16x16
    N, C_IN, H, W = 2, 4, 16, 16
    L1, L2, L3, L4 = 8, (4, 8), (4, 8), 8

    x = jax.random.normal(k_x, (N, C_IN, H, W), jnp.float32)
    params = make_inception_params(k_p, C_IN, L1, L2, L3, L4)
    packed = pack_inception_params(params, W)

    out = inception_forward(packed, x)
    out = jax.block_until_ready(out)

    expected_channels = L1 + L2[1] + L3[1] + L4
    assert out.shape == (N, expected_channels, H, W), out.shape
    assert jnp.all(out >= 0.0)  # every branch ends in ReLU

    # numerical check vs f32 reference (kernel matmuls run in bf16 on the MXU)
    ref = _reference_forward(params, x)
    np.testing.assert_allclose(np.asarray(out), np.asarray(ref),
                               rtol=5e-2, atol=5e-2)

    print("KERNEL_OK")
</pallas_src>

<mosaic_0001>
module attributes {stable_mosaic.version = 11 : i64} {
  func.func @_inception_kernel(%arg0: i32, %arg1: memref<1x16x64xf32, #tpu.memory_space<vmem>>, %arg2: memref<64x256xbf16, #tpu.memory_space<vmem>>, %arg3: memref<1x256xf32, #tpu.memory_space<vmem>>, %arg4: memref<3x72x128xbf16, #tpu.memory_space<vmem>>, %arg5: memref<1x128xf32, #tpu.memory_space<vmem>>, %arg6: memref<5x80x128xbf16, #tpu.memory_space<vmem>>, %arg7: memref<1x128xf32, #tpu.memory_space<vmem>>, %arg8: memref<64x128xbf16, #tpu.memory_space<vmem>>, %arg9: memref<1x128xf32, #tpu.memory_space<vmem>>, %arg10: memref<1x16x512xf32, #tpu.memory_space<vmem>>, %arg11: memref<18x72xbf16, #tpu.memory_space<vmem>>, %arg12: memref<20x80xbf16, #tpu.memory_space<vmem>>, %arg13: memref<18x72xf32, #tpu.memory_space<vmem>>) attributes {dimension_semantics = [#tpu.dimension_semantics<parallel>], iteration_bounds = array<i64: 2>, scalar_prefetch = 0 : i64, scratch_operands = 3 : i64, tpu.core_type = #tpu.core_type<tc>, window_params = [{transform_indices = @transform_0, window_bounds = array<i64: 1, 16, 64>}, {pipeline_mode = #tpu.pipeline_mode<synchronous>, transform_indices = @transform_1, window_bounds = array<i64: 64, 256>}, {pipeline_mode = #tpu.pipeline_mode<synchronous>, transform_indices = @transform_2, window_bounds = array<i64: 1, 256>}, {pipeline_mode = #tpu.pipeline_mode<synchronous>, transform_indices = @transform_3, window_bounds = array<i64: 3, 72, 128>}, {pipeline_mode = #tpu.pipeline_mode<synchronous>, transform_indices = @transform_4, window_bounds = array<i64: 1, 128>}, {pipeline_mode = #tpu.pipeline_mode<synchronous>, transform_indices = @transform_5, window_bounds = array<i64: 5, 80, 128>}, {pipeline_mode = #tpu.pipeline_mode<synchronous>, transform_indices = @transform_6, window_bounds = array<i64: 1, 128>}, {pipeline_mode = #tpu.pipeline_mode<synchronous>, transform_indices = @transform_7, window_bounds = array<i64: 64, 128>}, {pipeline_mode = #tpu.pipeline_mode<synchronous>, transform_indices = @transform_8, window_bounds = array<i64: 1, 128>}, {transform_indices = @transform_9, window_bounds = array<i64: 1, 16, 512>}]} {
    %c0 = arith.constant 0 : index
    %c0_0 = arith.constant 0 : index
    %c0_1 = arith.constant 0 : index
    %0 = vector.load %arg1[%c0, %c0_0, %c0_1] : memref<1x16x64xf32, #tpu.memory_space<vmem>>, vector<1x16x64xf32>
    %1 = vector.shape_cast %0 : vector<1x16x64xf32> to vector<16x64xf32>
    %2 = arith.truncf %1 : vector<16x64xf32> to vector<16x64xbf16>
    %c0_2 = arith.constant 0 : index
    %c0_3 = arith.constant 0 : index
    %3 = vector.load %arg2[%c0_2, %c0_3] : memref<64x256xbf16, #tpu.memory_space<vmem>>, vector<64x256xbf16>
    %cst = arith.constant dense<0.000000e+00> : vector<16x256xf32>
    %4 = tpu.matmul %2, %3, %cst {dimension_numbers = #tpu.dot_dimension_numbers<[1], [0], [0], [1], [0, 0, 1, 1], [], []>} : vector<16x64xbf16>, vector<64x256xbf16>, vector<16x256xf32> -> vector<16x256xf32>
    %c0_4 = arith.constant 0 : index
    %c0_5 = arith.constant 0 : index
    %5 = vector.load %arg3[%c0_4, %c0_5] : memref<1x256xf32, #tpu.memory_space<vmem>>, vector<1x256xf32>
    %6 = vector.broadcast %5 : vector<1x256xf32> to vector<16x256xf32>
    %7 = arith.addf %4, %6 : vector<16x256xf32>
    %cst_6 = arith.constant 0.000000e+00 : f32
    %8 = vector.broadcast %cst_6 : f32 to vector<16x256xf32>
    %9 = arith.maximumf %7, %8 : vector<16x256xf32>
    %10 = vector.extract_strided_slice %9 {offsets = [0, 0], sizes = [16, 128], strides = [1, 1]} : vector<16x256xf32> to vector<16x128xf32>
    %11 = vector.extract_strided_slice %9 {offsets = [0, 128], sizes = [16, 64], strides = [1, 1]} : vector<16x256xf32> to vector<16x64xf32>
    %12 = vector.extract_strided_slice %9 {offsets = [0, 192], sizes = [16, 64], strides = [1, 1]} : vector<16x256xf32> to vector<16x64xf32>
    %cst_7 = arith.constant 0.000000e+00 : bf16
    %13 = vector.broadcast %cst_7 : bf16 to vector<18x72xbf16>
    %c0_8 = arith.constant 0 : index
    %c0_9 = arith.constant 0 : index
    %14 = vector.load %arg11[%c0_8, %c0_9] : memref<18x72xbf16, #tpu.memory_space<vmem>>, vector<18x72xbf16>
    tpu.vector_store %arg11[%c0_8, %c0_9], %13 {strides = array<i32>} : memref<18x72xbf16, #tpu.memory_space<vmem>>, vector<18x72xbf16>,
    %15 = arith.truncf %11 : vector<16x64xf32> to vector<16x64xbf16>
    %c1 = arith.constant 1 : index
    %c4 = arith.constant 4 : index
    %16 = vector.load %arg11[%c1, %c4] : memref<18x72xbf16, #tpu.memory_space<vmem>>, vector<16x64xbf16>
    tpu.vector_store %arg11[%c1, %c4], %15 {strides = array<i32>} : memref<18x72xbf16, #tpu.memory_space<vmem>>, vector<16x64xbf16>,
    %cst_10 = arith.constant 0.000000e+00 : f32
    %17 = vector.broadcast %cst_10 : f32 to vector<16x128xf32>
    %c0_11 = arith.constant 0 : index
    %c0_12 = arith.constant 0 : index
    %18 = vector.load %arg11[%c0_11, %c0_12] : memref<18x72xbf16, #tpu.memory_space<vmem>>, vector<16x72xbf16>
    %c0_13 = arith.constant 0 : index
    %c0_14 = arith.constant 0 : index
    %c0_15 = arith.constant 0 : index
    %19 = vector.load %arg4[%c0_13, %c0_14, %c0_15] : memref<3x72x128xbf16, #tpu.memory_space<vmem>>, vector<1x72x128xbf16>
    %20 = vector.shape_cast %19 : vector<1x72x128xbf16> to vector<72x128xbf16>
    %cst_16 = arith.constant dense<0.000000e+00> : vector<16x128xf32>
    %21 = tpu.matmul %18, %20, %cst_16 {dimension_numbers = #tpu.dot_dimension_numbers<[1], [0], [0], [1], [0, 0, 1, 1], [], []>} : vector<16x72xbf16>, vector<72x128xbf16>, vector<16x128xf32> -> vector<16x128xf32>
    %22 = arith.addf %17, %21 : vector<16x128xf32>
    %c1_17 = arith.constant 1 : index
    %c0_18 = arith.constant 0 : index
    %23 = vector.load %arg11[%c1_17, %c0_18] : memref<18x72xbf16, #tpu.memory_space<vmem>>, vector<16x72xbf16>
    %c1_19 = arith.constant 1 : index
    %c0_20 = arith.constant 0 : index
    %c0_21 = arith.constant 0 : index
    %24 = vector.load %arg4[%c1_19, %c0_20, %c0_21] : memref<3x72x128xbf16, #tpu.memory_space<vmem>>, vector<1x72x128xbf16>
    %25 = vector.shape_cast %24 : vector<1x72x128xbf16> to vector<72x128xbf16>
    %cst_22 = arith.constant dense<0.000000e+00> : vector<16x128xf32>
    %26 = tpu.matmul %23, %25, %cst_22 {dimension_numbers = #tpu.dot_dimension_numbers<[1], [0], [0], [1], [0, 0, 1, 1], [], []>} : vector<16x72xbf16>, vector<72x128xbf16>, vector<16x128xf32> -> vector<16x128xf32>
    %27 = arith.addf %22, %26 : vector<16x128xf32>
    %c2 = arith.constant 2 : index
    %c0_23 = arith.constant 0 : index
    %28 = vector.load %arg11[%c2, %c0_23] : memref<18x72xbf16, #tpu.memory_space<vmem>>, vector<16x72xbf16>
    %c2_24 = arith.constant 2 : index
    %c0_25 = arith.constant 0 : index
    %c0_26 = arith.constant 0 : index
    %29 = vector.load %arg4[%c2_24, %c0_25, %c0_26] : memref<3x72x128xbf16, #tpu.memory_space<vmem>>, vector<1x72x128xbf16>
    %30 = vector.shape_cast %29 : vector<1x72x128xbf16> to vector<72x128xbf16>
    %cst_27 = arith.constant dense<0.000000e+00> : vector<16x128xf32>
    %31 = tpu.matmul %28, %30, %cst_27 {dimension_numbers = #tpu.dot_dimension_numbers<[1], [0], [0], [1], [0, 0, 1, 1], [], []>} : vector<16x72xbf16>, vector<72x128xbf16>, vector<16x128xf32> -> vector<16x128xf32>
    %32 = arith.addf %27, %31 : vector<16x128xf32>
    %c0_28 = arith.constant 0 : index
    %c0_29 = arith.constant 0 : index
    %33 = vector.load %arg5[%c0_28, %c0_29] : memref<1x128xf32, #tpu.memory_space<vmem>>, vector<1x128xf32>
    %34 = vector.broadcast %33 : vector<1x128xf32> to vector<16x128xf32>
    %35 = arith.addf %32, %34 : vector<16x128xf32>
    %cst_30 = arith.constant 0.000000e+00 : f32
    %36 = vector.broadcast %cst_30 : f32 to vector<16x128xf32>
    %37 = arith.maximumf %35, %36 : vector<16x128xf32>
    %cst_31 = arith.constant 0.000000e+00 : bf16
    %38 = vector.broadcast %cst_31 : bf16 to vector<20x80xbf16>
    %c0_32 = arith.constant 0 : index
    %c0_33 = arith.constant 0 : index
    %39 = vector.load %arg12[%c0_32, %c0_33] : memref<20x80xbf16, #tpu.memory_space<vmem>>, vector<20x80xbf16>
    tpu.vector_store %arg12[%c0_32, %c0_33], %38 {strides = array<i32>} : memref<20x80xbf16, #tpu.memory_space<vmem>>, vector<20x80xbf16>,
    %40 = arith.truncf %12 : vector<16x64xf32> to vector<16x64xbf16>
    %c2_34 = arith.constant 2 : index
    %c8 = arith.constant 8 : index
    %41 = vector.load %arg12[%c2_34, %c8] : memref<20x80xbf16, #tpu.memory_space<vmem>>, vector<16x64xbf16>
    tpu.vector_store %arg12[%c2_34, %c8], %40 {strides = array<i32>} : memref<20x80xbf16, #tpu.memory_space<vmem>>, vector<16x64xbf16>,
    %cst_35 = arith.constant 0.000000e+00 : f32
    %42 = vector.broadcast %cst_35 : f32 to vector<16x128xf32>
    %c0_36 = arith.constant 0 : index
    %c0_37 = arith.constant 0 : index
    %43 = vector.load %arg12[%c0_36, %c0_37] : memref<20x80xbf16, #tpu.memory_space<vmem>>, vector<16x80xbf16>
    %c0_38 = arith.constant 0 : index
    %c0_39 = arith.constant 0 : index
    %c0_40 = arith.constant 0 : index
    %44 = vector.load %arg6[%c0_38, %c0_39, %c0_40] : memref<5x80x128xbf16, #tpu.memory_space<vmem>>, vector<1x80x128xbf16>
    %45 = vector.shape_cast %44 : vector<1x80x128xbf16> to vector<80x128xbf16>
    %cst_41 = arith.constant dense<0.000000e+00> : vector<16x128xf32>
    %46 = tpu.matmul %43, %45, %cst_41 {dimension_numbers = #tpu.dot_dimension_numbers<[1], [0], [0], [1], [0, 0, 1, 1], [], []>} : vector<16x80xbf16>, vector<80x128xbf16>, vector<16x128xf32> -> vector<16x128xf32>
    %47 = arith.addf %42, %46 : vector<16x128xf32>
    %c1_42 = arith.constant 1 : index
    %c0_43 = arith.constant 0 : index
    %48 = vector.load %arg12[%c1_42, %c0_43] : memref<20x80xbf16, #tpu.memory_space<vmem>>, vector<16x80xbf16>
    %c1_44 = arith.constant 1 : index
    %c0_45 = arith.constant 0 : index
    %c0_46 = arith.constant 0 : index
    %49 = vector.load %arg6[%c1_44, %c0_45, %c0_46] : memref<5x80x128xbf16, #tpu.memory_space<vmem>>, vector<1x80x128xbf16>
    %50 = vector.shape_cast %49 : vector<1x80x128xbf16> to vector<80x128xbf16>
    %cst_47 = arith.constant dense<0.000000e+00> : vector<16x128xf32>
    %51 = tpu.matmul %48, %50, %cst_47 {dimension_numbers = #tpu.dot_dimension_numbers<[1], [0], [0], [1], [0, 0, 1, 1], [], []>} : vector<16x80xbf16>, vector<80x128xbf16>, vector<16x128xf32> -> vector<16x128xf32>
    %52 = arith.addf %47, %51 : vector<16x128xf32>
    %c2_48 = arith.constant 2 : index
    %c0_49 = arith.constant 0 : index
    %53 = vector.load %arg12[%c2_48, %c0_49] : memref<20x80xbf16, #tpu.memory_space<vmem>>, vector<16x80xbf16>
    %c2_50 = arith.constant 2 : index
    %c0_51 = arith.constant 0 : index
    %c0_52 = arith.constant 0 : index
    %54 = vector.load %arg6[%c2_50, %c0_51, %c0_52] : memref<5x80x128xbf16, #tpu.memory_space<vmem>>, vector<1x80x128xbf16>
    %55 = vector.shape_cast %54 : vector<1x80x128xbf16> to vector<80x128xbf16>
    %cst_53 = arith.constant dense<0.000000e+00> : vector<16x128xf32>
    %56 = tpu.matmul %53, %55, %cst_53 {dimension_numbers = #tpu.dot_dimension_numbers<[1], [0], [0], [1], [0, 0, 1, 1], [], []>} : vector<16x80xbf16>, vector<80x128xbf16>, vector<16x128xf32> -> vector<16x128xf32>
    %57 = arith.addf %52, %56 : vector<16x128xf32>
    %c3 = arith.constant 3 : index
    %c0_54 = arith.constant 0 : index
    %58 = vector.load %arg12[%c3, %c0_54] : memref<20x80xbf16, #tpu.memory_space<vmem>>, vector<16x80xbf16>
    %c3_55 = arith.constant 3 : index
    %c0_56 = arith.constant 0 : index
    %c0_57 = arith.constant 0 : index
    %59 = vector.load %arg6[%c3_55, %c0_56, %c0_57] : memref<5x80x128xbf16, #tpu.memory_space<vmem>>, vector<1x80x128xbf16>
    %60 = vector.shape_cast %59 : vector<1x80x128xbf16> to vector<80x128xbf16>
    %cst_58 = arith.constant dense<0.000000e+00> : vector<16x128xf32>
    %61 = tpu.matmul %58, %60, %cst_58 {dimension_numbers = #tpu.dot_dimension_numbers<[1], [0], [0], [1], [0, 0, 1, 1], [], []>} : vector<16x80xbf16>, vector<80x128xbf16>, vector<16x128xf32> -> vector<16x128xf32>
    %62 = arith.addf %57, %61 : vector<16x128xf32>
    %c4_59 = arith.constant 4 : index
    %c0_60 = arith.constant 0 : index
    %63 = vector.load %arg12[%c4_59, %c0_60] : memref<20x80xbf16, #tpu.memory_space<vmem>>, vector<16x80xbf16>
    %c4_61 = arith.constant 4 : index
    %c0_62 = arith.constant 0 : index
    %c0_63 = arith.constant 0 : index
    %64 = vector.load %arg6[%c4_61, %c0_62, %c0_63] : memref<5x80x128xbf16, #tpu.memory_space<vmem>>, vector<1x80x128xbf16>
    %65 = vector.shape_cast %64 : vector<1x80x128xbf16> to vector<80x128xbf16>
    %cst_64 = arith.constant dense<0.000000e+00> : vector<16x128xf32>
    %66 = tpu.matmul %63, %65, %cst_64 {dimension_numbers = #tpu.dot_dimension_numbers<[1], [0], [0], [1], [0, 0, 1, 1], [], []>} : vector<16x80xbf16>, vector<80x128xbf16>, vector<16x128xf32> -> vector<16x128xf32>
    %67 = arith.addf %62, %66 : vector<16x128xf32>
    %c0_65 = arith.constant 0 : index
    %c0_66 = arith.constant 0 : index
    %68 = vector.load %arg7[%c0_65, %c0_66] : memref<1x128xf32, #tpu.memory_space<vmem>>, vector<1x128xf32>
    %69 = vector.broadcast %68 : vector<1x128xf32> to vector<16x128xf32>
    %70 = arith.addf %67, %69 : vector<16x128xf32>
    %cst_67 = arith.constant 0.000000e+00 : f32
    %71 = vector.broadcast %cst_67 : f32 to vector<16x128xf32>
    %72 = arith.maximumf %70, %71 : vector<16x128xf32>
    %cst_68 = arith.constant -3.40282347E+38 : f32
    %73 = vector.broadcast %cst_68 : f32 to vector<18x72xf32>
    %c0_69 = arith.constant 0 : index
    %c0_70 = arith.constant 0 : index
    %74 = vector.load %arg13[%c0_69, %c0_70] : memref<18x72xf32, #tpu.memory_space<vmem>>, vector<18x72xf32>
    tpu.vector_store %arg13[%c0_69, %c0_70], %73 {strides = array<i32>} : memref<18x72xf32, #tpu.memory_space<vmem>>, vector<18x72xf32>,
    %c1_71 = arith.constant 1 : index
    %c4_72 = arith.constant 4 : index
    %75 = vector.load %arg13[%c1_71, %c4_72] : memref<18x72xf32, #tpu.memory_space<vmem>>, vector<16x64xf32>
    tpu.vector_store %arg13[%c1_71, %c4_72], %1 {strides = array<i32>} : memref<18x72xf32, #tpu.memory_space<vmem>>, vector<16x64xf32>,
    %c1_73 = arith.constant 1 : index
    %c4_74 = arith.constant 4 : index
    %76 = vector.load %arg13[%c1_73, %c4_74] : memref<18x72xf32, #tpu.memory_space<vmem>>, vector<16x64xf32>
    %c0_75 = arith.constant 0 : index
    %c0_76 = arith.constant 0 : index
    %77 = vector.load %arg13[%c0_75, %c0_76] : memref<18x72xf32, #tpu.memory_space<vmem>>, vector<16x64xf32>
    %78 = arith.maximumf %76, %77 : vector<16x64xf32>
    %c0_77 = arith.constant 0 : index
    %c4_78 = arith.constant 4 : index
    %79 = vector.load %arg13[%c0_77, %c4_78] : memref<18x72xf32, #tpu.memory_space<vmem>>, vector<16x64xf32>
    %80 = arith.maximumf %78, %79 : vector<16x64xf32>
    %c0_79 = arith.constant 0 : index
    %c8_80 = arith.constant 8 : index
    %81 = vector.load %arg13[%c0_79, %c8_80] : memref<18x72xf32, #tpu.memory_space<vmem>>, vector<16x64xf32>
    %82 = arith.maximumf %80, %81 : vector<16x64xf32>
    %c1_81 = arith.constant 1 : index
    %c0_82 = arith.constant 0 : index
    %83 = vector.load %arg13[%c1_81, %c0_82] : memref<18x72xf32, #tpu.memory_space<vmem>>, vector<16x64xf32>
    %84 = arith.maximumf %82, %83 : vector<16x64xf32>
    %c1_83 = arith.constant 1 : index
    %c8_84 = arith.constant 8 : index
    %85 = vector.load %arg13[%c1_83, %c8_84] : memref<18x72xf32, #tpu.memory_space<vmem>>, vector<16x64xf32>
    %86 = arith.maximumf %84, %85 : vector<16x64xf32>
    %c2_85 = arith.constant 2 : index
    %c0_86 = arith.constant 0 : index
    %87 = vector.load %arg13[%c2_85, %c0_86] : memref<18x72xf32, #tpu.memory_space<vmem>>, vector<16x64xf32>
    %88 = arith.maximumf %86, %87 : vector<16x64xf32>
    %c2_87 = arith.constant 2 : index
    %c4_88 = arith.constant 4 : index
    %89 = vector.load %arg13[%c2_87, %c4_88] : memref<18x72xf32, #tpu.memory_space<vmem>>, vector<16x64xf32>
    %90 = arith.maximumf %88, %89 : vector<16x64xf32>
    %c2_89 = arith.constant 2 : index
    %c8_90 = arith.constant 8 : index
    %91 = vector.load %arg13[%c2_89, %c8_90] : memref<18x72xf32, #tpu.memory_space<vmem>>, vector<16x64xf32>
    %92 = arith.maximumf %90, %91 : vector<16x64xf32>
    %93 = arith.truncf %92 : vector<16x64xf32> to vector<16x64xbf16>
    %c0_91 = arith.constant 0 : index
    %c0_92 = arith.constant 0 : index
    %94 = vector.load %arg8[%c0_91, %c0_92] : memref<64x128xbf16, #tpu.memory_space<vmem>>, vector<64x128xbf16>
    %cst_93 = arith.constant dense<0.000000e+00> : vector<16x128xf32>
    %95 = tpu.matmul %93, %94, %cst_93 {dimension_numbers = #tpu.dot_dimension_numbers<[1], [0], [0], [1], [0, 0, 1, 1], [], []>} : vector<16x64xbf16>, vector<64x128xbf16>, vector<16x128xf32> -> vector<16x128xf32>
    %c0_94 = arith.constant 0 : index
    %c0_95 = arith.constant 0 : index
    %96 = vector.load %arg9[%c0_94, %c0_95] : memref<1x128xf32, #tpu.memory_space<vmem>>, vector<1x128xf32>
    %97 = vector.broadcast %96 : vector<1x128xf32> to vector<16x128xf32>
    %98 = arith.addf %95, %97 : vector<16x128xf32>
    %cst_96 = arith.constant 0.000000e+00 : f32
    %99 = vector.broadcast %cst_96 : f32 to vector<16x128xf32>
    %100 = arith.maximumf %98, %99 : vector<16x128xf32>
    %101 = tpu.concatenate %10, %37, %72, %100 in 1 : vector<16x128xf32>, vector<16x128xf32>, vector<16x128xf32>, vector<16x128xf32> -> vector<16x512xf32>
    %c0_97 = arith.constant 0 : index
    %c0_98 = arith.constant 0 : index
    %c0_99 = arith.constant 0 : index
    %102 = vector.load %arg10[%c0_97, %c0_98, %c0_99] : memref<1x16x512xf32, #tpu.memory_space<vmem>>, vector<1x16x512xf32>
    %103 = vector.shape_cast %102 : vector<1x16x512xf32> to vector<16x512xf32>
    %104 = vector.shape_cast %101 : vector<16x512xf32> to vector<1x16x512xf32>
    tpu.vector_store %arg10[%c0_97, %c0_98, %c0_99], %104 {strides = array<i32>} : memref<1x16x512xf32, #tpu.memory_space<vmem>>, vector<1x16x512xf32>,
    return
  }
  func.func @transform_0(%arg0: i32) -> (i32, i32, i32) {
    %c0_i32 = arith.constant 0 : i32
    %c0_i32_0 = arith.constant 0 : i32
    %c0_i32_1 = arith.constant 0 : i32
    return %arg0, %c0_i32, %c0_i32_0 : i32, i32, i32
  }
  func.func @transform_1(%arg0: i32) -> (i32, i32) {
    %c0_i32 = arith.constant 0 : i32
    %c0_i32_0 = arith.constant 0 : i32
    %c0_i32_1 = arith.constant 0 : i32
    return %c0_i32, %c0_i32_0 : i32, i32
  }
  func.func @transform_2(%arg0: i32) -> (i32, i32) {
    %c0_i32 = arith.constant 0 : i32
    %c0_i32_0 = arith.constant 0 : i32
    %c0_i32_1 = arith.constant 0 : i32
    return %c0_i32, %c0_i32_0 : i32, i32
  }
  func.func @transform_3(%arg0: i32) -> (i32, i32, i32) {
    %c0_i32 = arith.constant 0 : i32
    %c0_i32_0 = arith.constant 0 : i32
    %c0_i32_1 = arith.constant 0 : i32
    %c0_i32_2 = arith.constant 0 : i32
    return %c0_i32, %c0_i32_0, %c0_i32_1 : i32, i32, i32
  }
  func.func @transform_4(%arg0: i32) -> (i32, i32) {
    %c0_i32 = arith.constant 0 : i32
    %c0_i32_0 = arith.constant 0 : i32
    %c0_i32_1 = arith.constant 0 : i32
    return %c0_i32, %c0_i32_0 : i32, i32
  }
  func.func @transform_5(%arg0: i32) -> (i32, i32, i32) {
    %c0_i32 = arith.constant 0 : i32
    %c0_i32_0 = arith.constant 0 : i32
    %c0_i32_1 = arith.constant 0 : i32
    %c0_i32_2 = arith.constant 0 : i32
    return %c0_i32, %c0_i32_0, %c0_i32_1 : i32, i32, i32
  }
  func.func @transform_6(%arg0: i32) -> (i32, i32) {
    %c0_i32 = arith.constant 0 : i32
    %c0_i32_0 = arith.constant 0 : i32
    %c0_i32_1 = arith.constant 0 : i32
    return %c0_i32, %c0_i32_0 : i32, i32
  }
  func.func @transform_7(%arg0: i32) -> (i32, i32) {
    %c0_i32 = arith.constant 0 : i32
    %c0_i32_0 = arith.constant 0 : i32
    %c0_i32_1 = arith.constant 0 : i32
    return %c0_i32, %c0_i32_0 : i32, i32
  }
  func.func @transform_8(%arg0: i32) -> (i32, i32) {
    %c0_i32 = arith.constant 0 : i32
    %c0_i32_0 = arith.constant 0 : i32
    %c0_i32_1 = arith.constant 0 : i32
    return %c0_i32, %c0_i32_0 : i32, i32
  }
  func.func @transform_9(%arg0: i32) -> (i32, i32, i32) {
    %c0_i32 = arith.constant 0 : i32
    %c0_i32_0 = arith.constant 0 : i32
    %c0_i32_1 = arith.constant 0 : i32
    return %arg0, %c0_i32, %c0_i32_0 : i32, i32, i32
  }
}

</mosaic_0001>

<bundles_post_ra>
// kernel: inception_forward.1
= control target key start
LH: loop header
LB: loop body
LE: loop exit
PB: predicated region body
PF: predicated region fallthrough
CT: control target
= control target key end

     0   :  { %s1730_s30 = smov 0   ;;  %s2042_s0 = inlined_call_operand.vmem [shape: f32[2,16,64], index: 0, kind: input, shape index: {}]   ;;  %s2043_s1 = inlined_call_operand.vmem [shape: bf16[64,256], index: 1, kind: input, shape index: {}]   ;;  %s2044_s2 = inlined_call_operand.vmem [shape: f32[1,256], index: 2, kind: input, shape index: {}]   ;;  %s2045_s3 = inlined_call_operand.vmem [shape: bf16[3,72,128], index: 3, kind: input, shape index: {}]   ;;  %s2046_s4 = inlined_call_operand.vmem [shape: f32[1,128], index: 4, kind: input, shape index: {}]   ;;  %s2047_s5 = inlined_call_operand.vmem [shape: bf16[5,80,128], index: 5, kind: input, shape index: {}]   ;;  %s2048_s6 = inlined_call_operand.vmem [shape: f32[1,128], index: 6, kind: input, shape index: {}]   ;;  %s2049_s7 = inlined_call_operand.vmem [shape: bf16[64,128], index: 7, kind: input, shape index: {}]   ;;  %s2050_s8 = inlined_call_operand.vmem [shape: f32[1,128], index: 8, kind: input, shape index: {}]   ;;  %s2051_s9 = inlined_call_operand.vmem [shape: f32[2,16,512], index: 9, kind: output, shape index: {}]  }
   0x1 LB: > { %s1283_s10 = sadd.s32 4294967295, %s1673_s30   ;;  %p1287_p0 = scmp.ge.s32.totalorder %s1673_s30, 1  ;;  %s1673_s30 = sphi %s1730_s30, %s19_s30  }
   0x2   : > { %p287_p1 = scmp.lt.s32.totalorder %s1673_s30, 3 }
   0x4   : > { %p288_p2 = pnand %p1287_p0, %p287_p1 }
   0x5   : > { %p323_p3 = scmp.lt.s32.totalorder (!%p288_p2), %s1283_s10, 1  ;;  %s1676_s27 = smov (!%p288_p2), 4  }
   0x6   : > { %291 = sbr.rel (%p288_p2) target bundleno = 532 (0x214), region = 56  ;;  %s1677_s15 = smov (!%p288_p2), 124  }
   0x7   : > { %s1678_s16 = smov (!%p288_p2), 72  }
   0xb   : > { %v1567_v0 = vld [vmem:[%s2043_s1 + $0x34] sm:$0xf]  ;;  %v1320_v1 = vld [vmem:[%s2043_s1 + $0x38] sm:$0xf0]  ;;  %v1565_v2 = vld [vmem:[%s2043_s1 + $0x24] sm:$0xf] }
   0xc   : > { %v1323_v3 = vor.u32 %v1567_v0, %v1320_v1  ;;  %v1312_v4 = vld [vmem:[%s2043_s1 + $0x28] sm:$0xf0]  ;;  %s2057_s10 = smov (!%p323_p3, %s1283_s10), 1  ;;  %v1563_v6 = vld [vmem:[%s2043_s1 + $0x14] sm:$0xf]  ;;  %vm546_vm0 = vcmask 588800  }
   0xd   : > { %v1315_v5 = vor.u32 %v1565_v2, %v1312_v4  ;;  %v1304_v7 = vld [vmem:[%s2043_s1 + $0x18] sm:$0xf0]  ;;  %s1559_s23 = sshll.u32 %s2057_s10, 4  ;;  %v1675_v8 = vmov -3.4028235e+38   ;;  %vm391_vm1 = vcmask 523264  }
   0xe   : > { %413 = vmatpush.bf16.msra.mxu1 %v1323_v3  ;;  %1082 = vst.msk [vmem:[#allocation4] sm:$0xff] %vm546_vm0, %v1675_v8  ;;  %s327_s26 = scalar_lea.vmem %s2042_s0, %s1559_s23  ;;  %v1307_v10 = vor.u32 %v1563_v6, %v1304_v7  ;;  %v1561_v11 = vld [vmem:[%s2043_s1 + $0x4] sm:$0xf]  ;;  %v1296_v12 = vld [vmem:[%s2043_s1 + $0x8] sm:$0xf0]  ;;  %vm1084_vm2 = vcmask 582656  }
   0xf   : > { %1083 = vst.msk [vmem:[#allocation4 + $0x8] sm:$0xff] %vm546_vm0, %v1675_v8  ;;  %v334_v9 = vld [vmem:[%s327_s26] sm:$0xff]  ;;  %v335_v13 = vld [vmem:[%s327_s26 + $0x8] sm:$0xff]  ;;  %v1299_v14 = vor.u32 %v1561_v11, %v1296_v12  ;;  %vm1094_vm3 = vcmask 556064   ;;  %vm434_vm4 = vsmask.f32 256 }
  0x10   : > { %1088 = vrot.lane.b32.xlu0 %v334_v9, %s1676_s27  ;;  %v1771_v15 = vpack.c.bf16 %v335_v13, %v334_v9  ;;  %1085 = vst.msk [vmem:[#allocation4 + $0x10] sm:$0x3] %vm1084_vm2, %v1675_v8  ;;  %v1781_v19 = vld [vmem:[%s2044_s2] sm:$0x3]  ;;  %vm435_vm5 = vsmask.f32 4368 }
  0x11   : > { %v348_v25 = vperm.slane %v1781_v19, 1  ;;  %vm696_vm6 = vcmask 1040384   ;;  %vm697_vm7 = vcmask 1044484   ;;  %vm436_vm8 = vmor %vm434_vm4, %vm435_vm5  ;;  %v1318_v53 = vld [vmem:[%s2043_s1 + $0x30] sm:$0xf]  ;;  %vm430_vm10 = vcmask 581632  }
  0x12   : > { %414 = vmatpush.bf16.msra.mxu1 %v1315_v5  ;;  %vm698_vm9 = vmor %vm696_vm6, %vm697_vm7  ;;  %v1568_v54 = vld [vmem:[%s2043_s1 + $0x34] sm:$0xf0]  ;;  %v1679_v56 = vmov 0   ;;  %v1310_v57 = vld [vmem:[%s2043_s1 + $0x20] sm:$0xf]  ;;  %vm550_vm11 = vcmask 1043456  }
  0x13   : > { %v1319_v55 = vor.u32 %v1568_v54, %v1318_v53  ;;  %431 = vst.msk [vmem:[#allocation2 + $0x8] sm:$0x1] %vm430_vm10, %v1679_v56  ;;  %v1566_v58 = vld [vmem:[%s2043_s1 + $0x24] sm:$0xf0]  ;;  %v486_v59 = vld [vmem:[%s2045_s3 + $0x20] sm:$0xf] }
  0x14   : > { %v1311_v60 = vor.u32 %v1566_v58, %v1310_v57  ;;  %v1302_v61 = vld [vmem:[%s2043_s1 + $0x10] sm:$0xf]  ;;  %v1564_v62 = vld [vmem:[%s2043_s1 + $0x14] sm:$0xf0]  ;;  %v585_v63 = vunpack.c.l.b16 %v486_v59  ;;  %v1377_v3 = vld [vmem:[%s2045_s3 + $0x68] sm:$0xf] }
  0x15   : > { %399 = vmatpush.bf16.msra.mxu0 %v1319_v55  ;;  %v1303_v0 = vor.u32 %v1564_v62, %v1302_v61  ;;  %vm427_vm12 = vcmask 584704   ;;  %v649_v4 = vunpack.c.l.b16 %v1377_v3  ;;  %v1334_v5 = vld [vmem:[%s2045_s3 + $0x44] sm:$0xf]  ;;  %v1294_v6 = vld [vmem:[%s2043_s1] sm:$0xf]  ;;  %v1572_v9 = vld [vmem:[%s2045_s3 + $0x18] sm:$0xff] }
  0x16   : > { %415 = vmatpush.bf16.msra.mxu1 %v1307_v10  ;;  %v590_v1 = vpack.c.b16 %v585_v63, %v585_v63  ;;  %428 = vst.msk [vmem:[#allocation2] sm:$0xf] %vm427_vm12, %v1679_v56  ;;  %v536_v7 = vunpack.c.l.b16 %v1334_v5  ;;  %v1562_v8 = vld [vmem:[%s2043_s1 + $0x4] sm:$0xf0]  ;;  %vm689_vm13 = vcmask 650240   ;;  %vm692_vm14 = vcmask 648192  }
  0x17   : > { %429 = vst.msk [vmem:[#allocation2 + $0x4] sm:$0xf] %vm427_vm12, %v1679_v56  ;;  %v654_v10 = vpack.c.b16 %v649_v4, %v649_v4  ;;  %v1295_v11 = vor.u32 %v1562_v8, %v1294_v6  ;;  %vm471_vm15 = vcmask 548896   ;;  %v1587_v55 = vld [vmem:[%s2047_s5 + $0x30] sm:$0xff]  ;;  %v1605_v3 = vld [vmem:[%s2047_s5 + $0xc0] sm:$0xff]  ;;  %vm717_vm5 = vcmask 581696  }
  0x18   : > { %1090 = vrot.lane.b32.xlu0 %v335_v13, %s1676_s27  ;;  %v598_v2 = vsel %vm550_vm11, %v590_v1, 0  ;;  %v541_v12 = vpack.c.b16 %v536_v7, %v536_v7  ;;  %690 = vst.msk [vmem:[#allocation3] sm:$0xf] %vm689_vm13, %v1679_v56  ;;  %vm1893_vm2 = vmand %vm471_vm15, %vm434_vm4  ;;  %vm464_vm4 = vsmask.f32 7938  ;;  %v1591_v5 = vld [vmem:[%s2047_s5 + $0x50] sm:$0xff] }
  0x19   : > { %400 = vmatpush.bf16.msra.mxu0 %v1311_v60  ;;  %603 = vmatpush.bf16.msra.mxu3 %v598_v2  ;;  %v663_v13 = vsel %vm550_vm11, %v654_v10, 0  ;;  %691 = vst.msk [vmem:[#allocation3 + $0x4] sm:$0xf] %vm689_vm13, %v1679_v56  ;;  %v1597_v2 = vld [vmem:[%s2047_s5 + $0x80] sm:$0xff]  ;;  %vm713_vm6 = vcmask 584769   ;;  %vm715_vm10 = vcmask 584768  }
  0x1a   : > { %416 = vmatpush.bf16.msra.mxu1 %v1299_v14  ;;  %v552_v14 = vsel %vm550_vm11, %v541_v12, 0  ;;  %693 = vst.msk [vmem:[#allocation3 + $0x8] sm:$0x3] %vm692_vm14, %v1679_v56  ;;  %v1598_v56 = vld [vmem:[%s2047_s5 + $0x88] sm:$0xff]  ;;  %v1581_v6 = vld [vmem:[%s2047_s5] sm:$0xff]  ;;  %vm1021_vm12 = vcmask 1045504  }
  0x1b   : > { %557 = vmatpush.bf16.msra.mxu2 %v552_v14  ;;  %vm939_vm11 = vsmask.f32 6400  ;;  %s1560_s11 = sshll.u32 %s2057_s10, 6 }
  0x1c   : > { %s2019_s14 = scalar_lea.vmem %s2051_s9, %s1560_s11 }
  0x1d   : > { %1325 = vmatmul.msk.bf16.vlgmr.msra.gmra.mxu1 %vm391_vm1, %v1771_v15  ;;  %401 = vmatpush.bf16.msra.mxu0 %v1303_v0  ;;  %v1586_v0 = vld [vmem:[%s2047_s5 + $0x28] sm:$0xff]  ;;  %v466_v10 = vld [vmem:[#allocation2] sm:$0xf] }
  0x1e   : > { %604 = vmatpush.bf16.msra.mxu3 %v1572_v9 }
  0x21   : > { %402 = vmatpush.bf16.msra.mxu0 %v1295_v11 }
  0x24   : > { %1324 = vmatmul.msk.bf16.vlgmr.msra.gmra.mxu0 %vm391_vm1, %v1771_v15  ;;  %v1575_v15 = vld [vmem:[%s2045_s3 + $0x34] sm:$0xff] }
  0x25   : > { %668 = vmatpush.bf16.msrb.mxu0 %v663_v13 }
  0x82   : > { %v1089_v16 = vpop.permute.xlu0 %1088 }
  0x83   : > { %1095 = vst.msk [vmem:[#allocation4 + $0x1] sm:$0xff] %vm1094_vm3, %v1089_v16  ;;  %v1571_v16 = vld [vmem:[%s2045_s3 + $0x10] sm:$0xff] }
  0x84   : > { %605 = vmatpush.bf16.msra.mxu3 %v1571_v16 }
  0x8a   : > { %v1091_v17 = vpop.permute.xlu0 %1090  ;;  %v1776_v18 = vld [vmem:[#allocation4] sm:$0xff] }
  0x8b   : > { %1096 = vst.msk [vmem:[#allocation4 + $0x9] sm:$0xff] %vm1094_vm3, %v1091_v17  ;;  %v1785_v21 = vld [vmem:[#allocation4 + $0x1] sm:$0xff]  ;;  %vm463_vm3 = vcmask 551968  }
  0x8c   : > { %v1580_v17 = vld [vmem:[%s2045_s3 + $0x60] sm:$0xff]  ;;  %vm1963_vm7 = vmand %vm463_vm3, %vm464_vm4 }
  0x8d   : > { %669 = vmatpush.bf16.msrb.mxu0 %v1580_v17 }
  0x92   : > { %v1783_v20 = vld [vmem:[#allocation4 + $0x8] sm:$0xff] }
  0x93   : > { %v1787_v22 = vld [vmem:[#allocation4 + $0x9] sm:$0xff]  ;;  %v1634_v23 = vpack.i.bf16 %v1783_v20, %v1776_v18 }
  0x94   : > { %v1649_v24 = vpack.i.bf16 %v1787_v22, %v1785_v21  ;;  %v1797_v28 = vld [vmem:[#allocation4 + $0x2] sm:$0xff]  ;;  %v1799_v29 = vld [vmem:[#allocation4 + $0xa] sm:$0xff] }
  0x95   : > { %1635 = vrot.lane.b32.xlu1 %v1634_v23, %s1676_s27  ;;  %v1654_v31 = vpack.i.bf16 %v1799_v29, %v1797_v28 }
  0x96   : > { %1650 = vrot.lane.b32.xlu0 %v1649_v24, %s1677_s15  ;;  %1645 = vrot.lane.b32.xlu2 %v1649_v24, %s1676_s27  ;;  %v1570_v24 = vld [vmem:[%s2045_s3 + $0x8] sm:$0xff] }
  0x97   : > { %606 = vmatpush.bf16.msra.mxu3 %v1570_v24  ;;  %v1604_v24 = vld [vmem:[%s2047_s5 + $0xb8] sm:$0xff] }
  0x9a   : > { %v418_v26 = vpop.f32.mrf.mxu1 }
  0x9b   : > { %v419_v27 = vadd.f32 %v418_v26, %v348_v25  ;;  %v1569_v26 = vld [vmem:[%s2045_s3] sm:$0xff] }
  0x9c   : > { %607 = vmatpush.bf16.msra.mxu3 %v1569_v26 }
  0x9d   : > { %v424_v30 = vmax.f32 %v419_v27, 0.0  ;;  %1640 = vrot.lane.b32.xlu1 %v1634_v23, %s1677_s15  ;;  %v1576_v23 = vld [vmem:[%s2045_s3 + $0x3c] sm:$0xff]  ;;  %v1578_v27 = vld [vmem:[%s2045_s3 + $0x50] sm:$0xff] }
  0x9e   : > { %1655 = vrot.lane.b32.xlu0 %v1654_v31, %s1676_s27  ;;  %558 = vmatpush.bf16.msra.mxu2 %v1576_v23  ;;  %v1596_v23 = vld [vmem:[%s2047_s5 + $0x78] sm:$0xff] }
  0x9f   : > { %v432_v32 = vpack.c.bf16 %v424_v30, %v424_v30 }
  0xa1   : > { %v438_v33 = vshrl.u32 %v432_v32, 16  ;;  %v441_v37 = vshll.u32 %v432_v32, 16  ;;  %v699_v40 = vrot.slane %v432_v32, 7  ;;  %v1577_v32 = vld [vmem:[%s2045_s3 + $0x48] sm:$0xff] }
  0xa2   : > { %v420_v34 = vpop.f32.mrf.mxu1  ;;  %559 = vmatpush.bf16.msra.mxu2 %v1575_v15 }
  0xa3   : > { %v421_v35 = vadd.f32 %v420_v34, %v348_v25  ;;  %v440_v36 = vrot.slane %v438_v33, 7  ;;  %v700_v49 = vrot.slane %v699_v40, 4  ;;  %v1579_v25 = vld [vmem:[%s2045_s3 + $0x58] sm:$0xff]  ;;  %v1590_v33 = vld [vmem:[%s2047_s5 + $0x48] sm:$0xff] }
  0xa4   : > { %670 = vmatpush.bf16.msrb.mxu0 %v1579_v25  ;;  %v1573_v34 = vld [vmem:[%s2045_s3 + $0x24] sm:$0xff]  ;;  %800 = vmatpush.bf16.msrb.mxu1 %v1590_v33 }
  0xa5   : > { %v426_v38 = vmax.f32 %v421_v35, 0.0  ;;  %v443_v39 = vor.u32 %v441_v37, %v440_v36  ;;  %v444_v48 = vrot.slane %v440_v36, 4  ;;  %v1595_v35 = vld [vmem:[%s2047_s5 + $0x70] sm:$0xff]  ;;  %v473_v37 = vld [vmem:[#allocation2 + $0x8] sm:$0x1] }
  0xa6   : > { %704 = vrot.lane.b32.xlu0 %v699_v40, %s1678_s16  ;;  %911 = vmatpush.bf16.msrb.mxu3 %v1595_v35  ;;  %v1589_v40 = vld [vmem:[%s2047_s5 + $0x40] sm:$0xff]  ;;  %v1602_v36 = vld [vmem:[%s2047_s5 + $0xa8] sm:$0xff] }
  0xa7   : > { %v433_v41 = vpack.c.bf16 %v426_v38, %v426_v38  ;;  %454 = vrot.lane.b32.xlu1 %v443_v39, %s1676_s27  ;;  %v1585_v38 = vld [vmem:[%s2047_s5 + $0x20] sm:$0xff] }
  0xa8   : > { %671 = vmatpush.bf16.msrb.mxu0 %v1578_v27  ;;  %801 = vmatpush.bf16.msrb.mxu1 %v1589_v40 }
  0xa9   : > { %v446_v42 = vshrl.u32 %v433_v41, 16  ;;  %v449_v45 = vshll.u32 %v433_v41, 16  ;;  %v701_v47 = vrot.slane %v433_v41, 7 }
  0xab   : > { %v448_v43 = vrot.slane %v446_v42, 7  ;;  %v702_v51 = vsel %vm698_vm9, %v700_v49, %v701_v47  ;;  %v703_v52 = vrot.slane %v701_v47, 4  ;;  %v1588_v49 = vld [vmem:[%s2047_s5 + $0x38] sm:$0xff]  ;;  %vm506_vm9 = vsmask.f32 7424 }
  0xac   : > { %672 = vmatpush.bf16.msrb.mxu0 %v1577_v32  ;;  %802 = vmatpush.bf16.msrb.mxu1 %v1588_v49  ;;  %v1603_v32 = vld [vmem:[%s2047_s5 + $0xb0] sm:$0xff] }
  0xad   : > { %v453_v44 = vrot.slane %v448_v43, 4  ;;  %v451_v46 = vor.u32 %v449_v45, %v448_v43  ;;  %v1600_v45 = vld [vmem:[%s2047_s5 + $0x98] sm:$0xff] }
  0xaf   : > { %458 = vrot.lane.b32.xlu2 %v453_v44, %s1676_s27  ;;  %1660 = vrot.lane.b32.xlu1 %v1654_v31, %s1677_s15  ;;  %v452_v50 = vsel %vm436_vm8, %v444_v48, %v451_v46  ;;  %v1574_v31 = vld [vmem:[%s2045_s3 + $0x2c] sm:$0xff]  ;;  %v1584_v48 = vld [vmem:[%s2047_s5 + $0x18] sm:$0xff]  ;;  %vm628_vm8 = vcmask 1046528  }
  0xb0   : > { %560 = vmatpush.bf16.msra.mxu2 %v1574_v31  ;;  %v1594_v44 = vld [vmem:[%s2047_s5 + $0x68] sm:$0xff]  ;;  %993 = vmatpush.bf16.msra.mxu0 %v1600_v45 }
  0xb1   : > { %912 = vmatpush.bf16.msrb.mxu3 %v1594_v44  ;;  %803 = vmatpush.bf16.msrb.mxu1 %v1587_v55 }
  0xb4   : > { %561 = vmatpush.bf16.msra.mxu2 %v1573_v34 }
  0xb5   : > { %804 = vmatpush.bf16.msrb.mxu1 %v1586_v0 }
  0xb7   : > { %456 = vrot.lane.b32.xlu2 %v452_v50, %s1676_s27  ;;  %706 = vrot.lane.b32.xlu1 %v702_v51, %s1678_s16  ;;  %v1599_v50 = vld [vmem:[%s2047_s5 + $0x90] sm:$0xff]  ;;  %v1593_v51 = vld [vmem:[%s2047_s5 + $0x60] sm:$0xff] }
  0xb8   : > { %846 = vmatpush.bf16.msrb.mxu2 %v1585_v38  ;;  %994 = vmatpush.bf16.msra.mxu0 %v1599_v50 }
  0xb9   : > { %913 = vmatpush.bf16.msrb.mxu3 %v1593_v51  ;;  %1061 = vmatpush.bf16.msra.mxu1 %v1605_v3 }
  0xbc   : > { %847 = vmatpush.bf16.msrb.mxu2 %v1584_v48  ;;  %995 = vmatpush.bf16.msra.mxu0 %v1598_v56  ;;  %v1601_v48 = vld [vmem:[%s2047_s5 + $0xa0] sm:$0xff] }
  0xbd   : > { %1062 = vmatpush.bf16.msra.mxu1 %v1604_v24 }
  0xbf   : > { %708 = vrot.lane.b32.xlu2 %v703_v52, %s1678_s16  ;;  %v1583_v52 = vld [vmem:[%s2047_s5 + $0x10] sm:$0xff] }
  0xc0   : > { %848 = vmatpush.bf16.msrb.mxu2 %v1583_v52  ;;  %996 = vmatpush.bf16.msra.mxu0 %v1597_v2  ;;  %v1607_v2 = vld [vmem:[%s2049_s7 + $0x8] sm:$0xff] }
  0xc1   : > { %1063 = vmatpush.bf16.msra.mxu1 %v1603_v32 }
  0xc4   : > { %997 = vmatpush.bf16.msra.mxu0 %v1596_v23 }
  0xc5   : > { %1064 = vmatpush.bf16.msra.mxu1 %v1602_v36 }
  0xc9   : > { %1065 = vmatpush.bf16.msra.mxu1 %v1601_v48 }
  0xf0   : > { %v1875_v30 = vpop.permute.xlu2 %1645 }
  0xf1   : > { %v1648_v1 = vunpack.i.h.bf16 %v1875_v30 }
 0x107   : > { %v1636_v41 = vpop.permute.xlu1 %1635 }
 0x108   : > { %v1903_v42 = vpop.permute.xlu0 %1650  ;;  %v1638_v46 = vunpack.i.h.bf16 %v1636_v41  ;;  %v1637_v47 = vunpack.i.l.bf16 %v1636_v41 }
 0x109   : > { %v459_v39 = vpop.permute.xlu2 %458  ;;  %v1653_v11 = vunpack.i.h.bf16 %v1903_v42  ;;  %v1652_v12 = vunpack.i.l.bf16 %v1903_v42 }
 0x10a   : > { %v474_v43 = vsel %vm1893_vm2, %v459_v39, %v473_v37  ;;  %v1109_v53 = vmax.f32 %v1785_v21, %v1637_v47  ;;  %v1110_v54 = vmax.f32 %v1787_v22, %v1638_v46  ;;  %v1592_v21 = vld [vmem:[%s2047_s5 + $0x58] sm:$0xff]  ;;  %v1582_v22 = vld [vmem:[%s2047_s5 + $0x8] sm:$0xff] }
 0x10b   : > { %475 = vst [vmem:[#allocation2 + $0x8] sm:$0x1] %v474_v43  ;;  %914 = vmatpush.bf16.msrb.mxu3 %v1592_v21  ;;  %849 = vmatpush.bf16.msrb.mxu2 %v1582_v22 }
 0x10c   : > { %v1111_v62 = vmax.f32 %v1109_v53, %v1776_v18  ;;  %v1112_v63 = vmax.f32 %v1110_v54, %v1783_v20  ;;  %v1647_v18 = vunpack.i.l.bf16 %v1875_v30 }
 0x10f   : > { %v1641_v58 = vpop.permute.xlu1 %1640  ;;  %915 = vmatpush.bf16.msrb.mxu3 %v1591_v5  ;;  %850 = vmatpush.bf16.msrb.mxu2 %v1581_v6 }
 0x110   : > { %v1656_v59 = vpop.permute.xlu0 %1655  ;;  %v1643_v60 = vunpack.i.h.bf16 %v1641_v58  ;;  %v1642_v61 = vunpack.i.l.bf16 %v1641_v58 }
 0x111   : > { %v457_v57 = vpop.permute.xlu2 %456  ;;  %v1658_v30 = vunpack.i.h.bf16 %v1656_v59  ;;  %v1657_v31 = vunpack.i.l.bf16 %v1656_v59 }
 0x112   : > { %470 = vst.msk [vmem:[#allocation2 + $0x4] sm:$0xf] %vm463_vm3, %v457_v57  ;;  %v1119_v4 = vmax.f32 %v1111_v62, %v1642_v61  ;;  %v1120_v20 = vmax.f32 %v1112_v63, %v1643_v60  ;;  %v487_v14 = vld [vmem:[#allocation2 + $0x8] sm:$0x1]  ;;  %v1609_v61 = vld [vmem:[%s2049_s7 + $0x18] sm:$0xff]  ;;  %v1608_v62 = vld [vmem:[%s2049_s7 + $0x10] sm:$0xff] }
 0x113   : > { %v503_v27 = vunpack.c.l.b16 %v487_v14 }
 0x114   : > { %v1129_v7 = vmax.f32 %v1119_v4, %v1647_v18  ;;  %v1130_v8 = vmax.f32 %v1120_v20, %v1648_v1 }
 0x115   : > { %v505_v35 = vpack.c.b16 %v503_v27, %v503_v27 }
 0x116   : > { %v1137_v25 = vmax.f32 %v1129_v7, %v1652_v12  ;;  %v1138_v15 = vmax.f32 %v1130_v8, %v1653_v11  ;;  %v1606_v8 = vld [vmem:[%s2049_s7] sm:$0xff] }
 0x117   : > { %v515_v47 = vshll.u32 %v505_v35, 16  ;;  %v630_v52 = vrot.slane %v505_v35, 1 }
 0x118   : > { %v705_v16 = vpop.permute.xlu0 %704  ;;  %v1149_v33 = vmax.f32 %v1137_v25, %v1657_v31  ;;  %v1150_v34 = vmax.f32 %v1138_v15, %v1658_v30 }
 0x119   : > { %v709_v13 = vpop.permute.xlu2 %708  ;;  %v455_v17 = vpop.permute.xlu1 %454  ;;  %714 = vst.msk [vmem:[#allocation3] sm:$0xe] %vm713_vm6, %v705_v16  ;;  %v1618_v43 = vld [vmem:[#allocation2] sm:$0xf0]  ;;  %v517_v21 = vrot.slane %v515_v47, 1 }
 0x11a   : > { %718 = vst.msk [vmem:[#allocation3 + $0x8] sm:$0x1] %vm717_vm5, %v709_v13  ;;  %v467_v26 = vsel %vm1963_vm7, %v455_v17, %v466_v10  ;;  %v1151_v38 = vmax.f32 %v1149_v33, %v1797_v28  ;;  %v1152_v39 = vmax.f32 %v1150_v34, %v1799_v29 }
 0x11b   : > { %468 = vst [vmem:[#allocation2] sm:$0xf] %v467_v26 }
 0x120   : > { %v857_v1 = vld [vmem:[#allocation3] sm:$0xe] }
 0x121   : > { %v1661_v37 = vpop.permute.xlu1 %1660  ;;  %v731_v54 = vld [vmem:[#allocation3 + $0x8] sm:$0x1]  ;;  %v870_v7 = vunpack.c.l.b16 %v857_v1  ;;  %v1006_v33 = vld [vmem:[#allocation3] sm:$0xc] }
 0x122   : > { %v1663_v40 = vunpack.i.h.bf16 %v1661_v37  ;;  %v1662_v41 = vunpack.i.l.bf16 %v1661_v37  ;;  %v1611_v42 = vld [vmem:[#allocation2] sm:$0xff]   ;;  %v924_v55 = vld [vmem:[#allocation3 + $0x8] sm:$0x3]  ;;  %v748_v59 = vunpack.c.l.b16 %v731_v54  ;;  %v1019_v35 = vunpack.c.l.b16 %v1006_v33 }
 0x123   : > { %v1619_v44 = vld [vmem:[#allocation2] sm:$0xe]  ;;  %v510_v45 = vshll.u32 %v1611_v42, 16  ;;  %1368 = vmatmul.msk.bf16.vlgmr.msra.gmra.mxu3 %vm546_vm0, %v1611_v42  ;;  %v508_v28 = vshrl.u32 %v1611_v42, 16  ;;  %v937_v60 = vunpack.c.l.b16 %v924_v55 }
 0x124   : > { %v1620_v46 = vor.u32 %v1619_v44, %v1618_v43  ;;  %v1160_v49 = vmax.f32 %v1152_v39, %v1663_v40  ;;  %v1159_v50 = vmax.f32 %v1151_v38, %v1662_v41  ;;  %v750_v63 = vpack.c.b16 %v748_v59, %v748_v59  ;;  %v404_v41 = vpop.f32.mrf.mxu0 }
 0x125   : > { %v512_v29 = vrot.slane %v510_v45, 1  ;;  %v938_v0 = vpack.c.b16 %v937_v60, %v937_v60  ;;  %v347_v40 = vperm.slane %v1781_v19, 0 }
 0x126   : > { %v629_v51 = vrot.slane %v1620_v46, 1  ;;  %v1161_v53 = vpack.c.bf16 %v1160_v49, %v1159_v50  ;;  %v759_v18 = vshll.u32 %v750_v63, 16  ;;  %v873_v13 = vrot.slane %v750_v63, 1 }
 0x127   : > { %v513_v56 = vor.u32 %v512_v29, %v508_v28  ;;  %v949_v4 = vshrl.u32 %v938_v0, 16  ;;  %v952_v20 = vshll.u32 %v938_v0, 16  ;;  %v1023_v38 = vrot.slane %v938_v0, 2  ;;  %v1664_v28 = vld [vmem:[%s2046_s4] ss:$0 sm:$0xff] }
 0x128   : > { %v631_v57 = vsel %vm628_vm8, %v629_v51, %v630_v52  ;;  %1175 = vrot.lane.b32.xlu2 %v1161_v53, %s1677_s15  ;;  %v761_v12 = vrot.slane %v759_v18, 1  ;;  %v405_v42 = vadd.f32 %v404_v41, %v347_v40 }
 0x129   : > { %1394 = vmatmul.msk.bf16.vlgmr.msrb.gmra.mxu0 %vm546_vm0, %v631_v57  ;;  %v707_v22 = vpop.permute.xlu1 %706  ;;  %v518_v58 = vsel %vm506_vm9, %v513_v56, %v517_v21  ;;  %v951_v14 = vrot.slane %v949_v4, 1  ;;  %v954_v16 = vrot.slane %v952_v20, 2 }
 0x12a   : > { %716 = vst.msk [vmem:[#allocation3 + $0x4] sm:$0xf] %vm715_vm10, %v707_v22  ;;  %1351 = vmatmul.msk.bf16.vlgmr.msra.gmra.mxu2 %vm546_vm0, %v518_v58  ;;  %vm793_vm0 = vcmask 654336   ;;  %v423_v43 = vmax.f32 %v405_v42, 0.0 }
 0x12b   : > { %1208 = vmatpush.bf16.msra.mxu2 %v1609_v61  ;;  %v955_v32 = vor.u32 %v954_v16, %v951_v14  ;;  %v1666_v16 = vld [vmem:[%s2050_s8] ss:$0 sm:$0xff] }
 0x12c   : > { %1220 = vst [vmem:[%s2019_s14] sm:$0xff] %v423_v43  ;;  %v406_v44 = vpop.f32.mrf.mxu0 }
 0x12d   : > { %v407_v45 = vadd.f32 %v406_v44, %v347_v40 }
 0x12f   : > { %1209 = vmatpush.bf16.msra.mxu2 %v1608_v62  ;;  %v425_v46 = vmax.f32 %v407_v45, 0.0 }
 0x131   : > { %v1615_v3 = vld [vmem:[#allocation3] sm:$0xff]   ;;  %1224 = vst [vmem:[%s2019_s14 + $0x20] sm:$0xff] %v425_v46 }
 0x132   : > { %v754_v5 = vshll.u32 %v1615_v3, 16  ;;  %v1617_v6 = vunpack.c.h.b16 %v1615_v3  ;;  %v752_v9 = vshrl.u32 %v1615_v3, 16 }
 0x133   : > { %1210 = vmatpush.bf16.msra.mxu2 %v1607_v2 }
 0x134   : > { %v756_v10 = vrot.slane %v754_v5, 1  ;;  %v871_v11 = vpack.c.b16 %v1617_v6, %v870_v7  ;;  %v1020_v36 = vpack.c.b16 %v1617_v6, %v1019_v35 }
 0x136   : > { %v757_v17 = vor.u32 %v756_v10, %v752_v9  ;;  %v872_v23 = vrot.slane %v871_v11, 1  ;;  %v941_v24 = vshrl.u32 %v871_v11, 16  ;;  %v944_v25 = vshll.u32 %v871_v11, 16 }
 0x137   : > { %1211 = vmatpush.bf16.msra.mxu2 %v1606_v8  ;;  %v1022_v37 = vrot.slane %v1020_v36, 2 }
 0x138   : > { %v762_v15 = vsel %vm506_vm9, %v757_v17, %v761_v12  ;;  %v874_v26 = vsel %vm628_vm8, %v872_v23, %v873_v13  ;;  %v943_v27 = vrot.slane %v941_v24, 1  ;;  %v946_v30 = vrot.slane %v944_v25, 2 }
 0x139   : > { %1425 = vmatmul.msk.bf16.vlgmr.msrb.gmra.mxu1 %vm793_vm0, %v762_v15  ;;  %1477 = vmatmul.msk.bf16.vlgmr.msrb.gmra.mxu3 %vm793_vm0, %v874_v26  ;;  %v1024_v39 = vsel %vm1021_vm12, %v1022_v37, %v1023_v38 }
 0x13a   : > { %1446 = vmatmul.msk.bf16.vlgmr.msrb.gmra.mxu2 %vm793_vm0, %v1615_v3  ;;  %v947_v31 = vor.u32 %v946_v30, %v943_v27  ;;  %v1665_v3 = vld [vmem:[%s2048_s6] ss:$0 sm:$0xff] }
 0x13c   : > { %v956_v34 = vsel %vm939_vm11, %v947_v31, %v955_v32 }
 0x13d   : > { %1508 = vmatmul.msk.bf16.vlgmr.msra.gmra.mxu0 %vm793_vm0, %v956_v34 }
 0x149   : > { %1539 = vmatmul.msk.bf16.vlgmr.msra.gmra.mxu1 %vm793_vm0, %v1024_v39 }
 0x182   : > { %v1176_v47 = vpop.permute.xlu2 %1175 }
 0x183   : > { %1556 = vmatmul.msk.bf16.vlgmr.msra.gmra.mxu2 %vm391_vm1, %v1176_v47 }
 0x1a6   : > { %v609_v19 = vpop.f32.mrf.mxu3  ;;  %v674_v48 = vpop.f32.mrf.mxu0 }
 0x1ad   : > { %v563_v49 = vpop.f32.mrf.mxu2 }
 0x1ae   : > { %v610_v50 = vadd.f32 %v609_v19, %v563_v49  ;;  %v611_v53 = vpop.f32.mrf.mxu3  ;;  %v676_v57 = vpop.f32.mrf.mxu0 }
 0x1b0   : > { %v679_v29 = vadd.f32 %v674_v48, %v610_v50 }
 0x1b2   : > { %v685_v51 = vadd.f32 %v1664_v28, %v679_v29 }
 0x1b4   : > { %v687_v52 = vmax.f32 %v685_v51, 0.0 }
 0x1b5   : > { %v565_v54 = vpop.f32.mrf.mxu2 }
 0x1b6   : > { %1221 = vst [vmem:[%s2019_s14 + $0x8] sm:$0xff] %v687_v52  ;;  %v612_v55 = vadd.f32 %v611_v53, %v565_v54  ;;  %v806_v56 = vpop.f32.mrf.mxu1 }
 0x1b8   : > { %v680_v21 = vadd.f32 %v676_v57, %v612_v55 }
 0x1ba   : > { %v686_v22 = vadd.f32 %v1664_v28, %v680_v21  ;;  %v999_v0 = vpop.f32.mrf.mxu0 }
 0x1bc   : > { %v688_v58 = vmax.f32 %v686_v22, 0.0  ;;  %v917_v60 = vpop.f32.mrf.mxu3 }
 0x1bd   : > { %v852_v59 = vpop.f32.mrf.mxu2 }
 0x1be   : > { %1225 = vst [vmem:[%s2019_s14 + $0x28] sm:$0xff] %v688_v58  ;;  %v853_v61 = vadd.f32 %v852_v59, %v806_v56  ;;  %v808_v62 = vpop.f32.mrf.mxu1 }
 0x1c0   : > { %v922_v63 = vadd.f32 %v917_v60, %v853_v61 }
 0x1c2   : > { %v1004_v2 = vadd.f32 %v999_v0, %v922_v63  ;;  %v1001_v9 = vpop.f32.mrf.mxu0 }
 0x1c4   : > { %v919_v5 = vpop.f32.mrf.mxu3 }
 0x1c5   : > { %v854_v1 = vpop.f32.mrf.mxu2 }
 0x1c6   : > { %v855_v18 = vadd.f32 %v854_v1, %v808_v62  ;;  %v1067_v4 = vpop.f32.mrf.mxu1 }
 0x1c7   : > { %v1072_v20 = vadd.f32 %v1067_v4, %v1004_v2 }
 0x1c8   : > { %v923_v6 = vadd.f32 %v919_v5, %v855_v18 }
 0x1c9   : > { %v1078_v7 = vadd.f32 %v1665_v3, %v1072_v20 }
 0x1ca   : > { %v1005_v10 = vadd.f32 %v1001_v9, %v923_v6 }
 0x1cb   : > { %v1080_v8 = vmax.f32 %v1078_v7, 0.0 }
 0x1cd   : > { %1222 = vst [vmem:[%s2019_s14 + $0x10] sm:$0xff] %v1080_v8 }
 0x1ce   : > { %v1069_v11 = vpop.f32.mrf.mxu1 }
 0x1cf   : > { %v1073_v12 = vadd.f32 %v1069_v11, %v1005_v10 }
 0x1d1   : > { %v1079_v13 = vadd.f32 %v1665_v3, %v1073_v12 }
 0x1d3   : > { %v1081_v14 = vmax.f32 %v1079_v13, 0.0 }
 0x1d5   : > { %1226 = vst [vmem:[%s2019_s14 + $0x30] sm:$0xff] %v1081_v14 }
 0x206   : > { %v1213_v17 = vpop.f32.mrf.mxu2 }
 0x207   : > { %v1214_v23 = vadd.f32 %v1666_v16, %v1213_v17 }
 0x209   : > { %v1218_v24 = vmax.f32 %v1214_v23, 0.0 }
 0x20b   : > { %1223 = vst [vmem:[%s2019_s14 + $0x18] sm:$0xff] %v1218_v24 }
 0x20e   : > { %v1215_v25 = vpop.f32.mrf.mxu2 }
 0x20f   : > { %v1216_v15 = vadd.f32 %v1666_v16, %v1215_v25 }
 0x211   : > { %v1219_v26 = vmax.f32 %v1216_v15, 0.0 }
 0x213   : > { %1227 = vst [vmem:[%s2019_s14 + $0x38] sm:$0xff] %v1219_v26 }
 0x214 PF: > { %s19_s30 = sadd.s32 1, %s1673_s30  }
 0x215   : > { %p16_p4 = scmp.ge.s32.totalorder %s19_s30, 4  }
 0x217   :  { %18 = sbr.rel (!%p16_p4) target bundleno = 1 (0x1), region = 92 }

</bundles_post_ra>
